<compile_context>
chip_gen: v7x
topology: tpu7x:2x2x1
jax: 0.10.0
libtpu: 0.0.40
codegen_flags: <defaults>
</compile_context>

<pallas_src>
import jax
import jax.numpy as jnp
import numpy as np
from jax.experimental import pallas as pl
from jax.experimental.pallas import tpu as pltpu

# ---- problem sizes (small, consistent with the module's forward) -----------
B = 2            # batch size (len(conds_list))
C = 4            # latent channels
H = W = 16       # latent spatial
HW = H * W
T = 8            # text tokens
D = 32           # text embedding dim
IMG_COND_GAIN = 0.1


# =============================================================================
# Fast-path kernel (standard CFG).  Per grid step (one group of images whose
# latent rows fill all 8 sublanes):
#   base        = (blockdiag(Wc) * c_in) @ x + g * img            (1 MXU push)
#   x_out_cond  = base + bias_cond                                  (VPU)
#   x_out_unc   = base + bias_uncond                                (VPU)
#   denoised    = x_out_unc + (x_out_cond - x_out_unc) * w_col      (VPU)
# cond_scale is already folded into w_col; c_in into the mix weight.
# =============================================================================
def _standard_cfg_kernel(x_ref, img_ref, wb_ref, bias_ref, wcol_ref, out_ref):
    base = jnp.dot(wb_ref[0], x_ref[...],
                   preferred_element_type=jnp.float32) \
        + IMG_COND_GAIN * img_ref[...]                      # (rows, HW)
    x_out_cond = base + bias_ref[0]                         # + (rows, 1)
    x_out_uncond = base + bias_ref[1]
    # combine_denoised, identity cond_index: single full unmasked store.
    out_ref[...] = x_out_uncond + (x_out_cond - x_out_uncond) * wcol_ref[...]


# =============================================================================
# Generic fallback kernel (repeats == 1, but cond_index may be a permutation):
# keeps the x_out halves in a VMEM scratch and gathers x_out[cond_index]
# dynamically.  Used only when conds_list is not the standard identity case.
# =============================================================================
def _make_generic_cfg_kernel(bsz, cc, n_cond):
    def kernel(cidx_ref, wscl_ref,                       # SMEM (prefetch)
               x_ref, img_ref, wb_ref, bias_ref,         # VMEM inputs
               out_ref,                                  # VMEM output
               xout_ref):                                # VMEM scratch
        base = jnp.dot(wb_ref[...], x_ref[...],
                       preferred_element_type=jnp.float32) \
            + IMG_COND_GAIN * img_ref[...]               # (bsz*cc, HW)
        for b in range(bsz):                             # static, tiny
            bb = base[b * cc:(b + 1) * cc, :]
            xout_ref[b] = bb + bias_ref[b]               # cond row b
            xout_ref[n_cond + b] = bb + bias_ref[n_cond + b]   # uncond row b
        for i in range(bsz):                             # static, tiny
            du = xout_ref[n_cond + i]
            ci = cidx_ref[i]                             # SMEM int32 (clamped host-side)
            wt = wscl_ref[i]                             # SMEM f32 (cond_scale folded)
            out_ref[i * cc:(i + 1) * cc, :] = du + (xout_ref[ci] - du) * wt
    return kernel


# ---------------------------------------------------------------------------
# Jitted forward cores (all per-call tensor plumbing fused into one program).
# ---------------------------------------------------------------------------
@jax.jit
def _standard_cfg_forward(x, sigma, uncond, tensor, image_cond,
                          wb_base_grp, wd, wcol):
    bsz, cc, hh, ww = x.shape
    hw = hh * ww
    grp_rows = wb_base_grp.shape[0]                      # = imgs_per_group * cc
    groups = (bsz * cc) // grp_rows

    x_flat = x.reshape(bsz * cc, hw)                     # lane/sublane-dense
    img_flat = image_cond.reshape(bsz * cc, hw)          # image_uncond == image_cond

    # Fold c_in = 1/(sigma^2+1) into the rows of the block-diagonal mix weight.
    c_rows = jnp.repeat(1.0 / (sigma * sigma + 1.0), cc)             # (bsz*cc,)
    wb_scaled = wb_base_grp[None, :, :] * c_rows.reshape(groups, grp_rows, 1)

    # Pooled-text bias: 2*bsz*cc floats, computed here (fused XLA) instead of an
    # N=1 in-kernel matvec.  cond_in = cat([tensor, uncond]).
    cond_in = jnp.concatenate([tensor, uncond], axis=0)               # (2B, T, D)
    bias = cond_in.mean(axis=1) @ wd.T                                # (2B, cc)
    bias2 = bias.reshape(2, bsz * cc, 1)                              # cond / uncond halves

    out_flat = pl.pallas_call(
        _standard_cfg_kernel,
        out_shape=jax.ShapeDtypeStruct((bsz * cc, hw), jnp.float32),
        grid_spec=pltpu.PrefetchScalarGridSpec(
            num_scalar_prefetch=0,
            grid=(groups,),
            in_specs=[
                pl.BlockSpec((grp_rows, hw), lambda g: (g, 0)),              # x
                pl.BlockSpec((grp_rows, hw), lambda g: (g, 0)),              # image_cond
                pl.BlockSpec((1, grp_rows, grp_rows), lambda g: (g, 0, 0)),  # mix weight
                pl.BlockSpec((2, grp_rows, 1), lambda g: (0, g, 0)),         # text bias
                pl.BlockSpec((grp_rows, 1), lambda g: (g, 0)),               # CFG weights
            ],
            out_specs=pl.BlockSpec((grp_rows, hw), lambda g: (g, 0)),
        ),
        compiler_params=pltpu.CompilerParams(
            dimension_semantics=("parallel",)),   # feeds v7x's 2nd TC when groups > 1
    )(x_flat, img_flat, wb_scaled, bias2, wcol)
    return out_flat.reshape(bsz, cc, hh, ww)


@jax.jit
def _generic_cfg_forward(x, sigma, uncond, tensor, image_cond,
                         wb_base, wd, cidx, wscl):
    bsz, cc, hh, ww = x.shape
    hw = hh * ww
    n_cond = bsz
    n_text = 2 * bsz

    x_flat = x.reshape(bsz * cc, hw)
    img_flat = image_cond.reshape(bsz * cc, hw)
    c_rows = jnp.repeat(1.0 / (sigma * sigma + 1.0), cc)
    wb_scaled = wb_base * c_rows[:, None]
    cond_in = jnp.concatenate([tensor, uncond], axis=0)
    bias = (cond_in.mean(axis=1) @ wd.T).reshape(n_text, cc, 1)

    out_flat = pl.pallas_call(
        _make_generic_cfg_kernel(bsz, cc, n_cond),
        out_shape=jax.ShapeDtypeStruct((bsz * cc, hw), jnp.float32),
        grid_spec=pltpu.PrefetchScalarGridSpec(
            num_scalar_prefetch=2,                      # cond_index, scaled weights
            grid=(1,),
            in_specs=[
                pl.BlockSpec((bsz * cc, hw), lambda i, ci, w: (0, 0)),
                pl.BlockSpec((bsz * cc, hw), lambda i, ci, w: (0, 0)),
                pl.BlockSpec((bsz * cc, bsz * cc), lambda i, ci, w: (0, 0)),
                pl.BlockSpec((n_text, cc, 1), lambda i, ci, w: (0, 0, 0)),
            ],
            out_specs=pl.BlockSpec((bsz * cc, hw), lambda i, ci, w: (0, 0)),
            scratch_shapes=[pltpu.VMEM((n_text, cc, hw), jnp.float32)],   # x_out
        ),
        compiler_params=pltpu.CompilerParams(
            dimension_semantics=("arbitrary",)),
    )(cidx, wscl, x_flat, img_flat, wb_scaled, bias)
    return out_flat.reshape(bsz, cc, hh, ww)


def _imgs_per_group(bsz, cc):
    """Smallest #images whose latent rows fill whole 8-row sublane slabs."""
    ipg = 1
    while (ipg * cc) % 8 != 0 and ipg < bsz:
        ipg += 1
    if (ipg * cc) % 8 != 0 or bsz % ipg != 0:
        ipg = bsz            # whole batch as one (full-array) block
    return ipg


# =============================================================================
# CFGDenoiser.forward (standard branch: not edit model, no skip_uncond,
# matching cond/uncond token counts, batch_cond_uncond=True, mask=None).
# =============================================================================
def make_cfg_denoiser(wc, wd):
    """Builds the denoiser; static inner-model weights (kron blocks) are
    hoisted/cached here instead of being rebuilt every sampler step."""
    cc = wc.shape[0]
    wb_cache = {}

    def _wb_base(n_images):
        key = int(n_images)
        if key not in wb_cache:
            wb_cache[key] = jnp.kron(jnp.eye(key, dtype=wc.dtype), wc)
        return wb_cache[key]

    def forward(x, sigma, uncond, tensor, cond_scale, image_cond, conds_list):
        bsz = x.shape[0]
        repeats = [len(c) for c in conds_list]
        if any(r != 1 for r in repeats):
            # TODO(synk): AND prompts (repeats > 1) / skip_uncond / edit-model
            # paths of CFGDenoiser.forward are not implemented in Pallas.
            raise NotImplementedError("only repeats == 1 (standard CFG) supported")
        n_cond = sum(repeats)
        assert n_cond == bsz, "uncond row offset assumes n_cond == batch size"

        cidx = [conds_list[i][0][0] for i in range(bsz)]
        wts = [conds_list[i][0][1] for i in range(bsz)]

        if all(ci == i for i, ci in enumerate(cidx)):
            # Standard path: fully vectorized; cond_scale folded into the
            # per-row CFG weight column on the host.
            ipg = _imgs_per_group(bsz, cc)
            wcol = jnp.asarray(
                np.repeat(np.asarray(wts, np.float32) * np.float32(cond_scale),
                          cc).reshape(bsz * cc, 1))
            return _standard_cfg_forward(x, sigma, uncond, tensor, image_cond,
                                         _wb_base(ipg), wd, wcol)

        # Non-identity cond_index: dynamic-gather fallback (indices clamped so
        # an out-of-range cond index can never read stale VMEM).
        cidx_arr = jnp.asarray(np.clip(np.asarray(cidx, np.int32), 0, n_cond - 1))
        wscl = jnp.asarray(np.asarray(wts, np.float32) * np.float32(cond_scale))
        return _generic_cfg_forward(x, sigma, uncond, tensor, image_cond,
                                    _wb_base(bsz), wd, cidx_arr, wscl)

    return forward


# ---------------------------- pure-JAX reference -----------------------------
def reference_forward(x, sigma, uncond, tensor, cond_scale, image_cond,
                      conds_list, wc, wd):
    bsz, cc, hh, ww = x.shape
    hw = hh * ww
    x_in = jnp.concatenate([x, x], 0)
    sigma_in = jnp.concatenate([sigma, sigma], 0)
    cond_in = jnp.concatenate([tensor, uncond], 0)
    image_cond_in = jnp.concatenate([image_cond, image_cond], 0)

    xf = x_in.reshape(2 * bsz, cc, hw)
    c_in = 1.0 / (sigma_in ** 2 + 1.0)
    mixed = jnp.einsum('oc,bcp->bop', wc, xf)
    bias = jnp.einsum('od,bd->bo', wd, cond_in.mean(axis=1))
    x_out = (mixed * c_in[:, None, None] + bias[:, :, None]
             + IMG_COND_GAIN * image_cond_in.reshape(2 * bsz, cc, hw))

    du = x_out[bsz:]
    denoised = du
    for i, conds in enumerate(conds_list):
        for ci, wt in conds:
            denoised = denoised.at[i].add((x_out[ci] - du[i]) * (wt * cond_scale))
    return denoised.reshape(bsz, cc, hh, ww)


if __name__ == "__main__":
    key = jax.random.PRNGKey(0)
    kx, ks, ku, kt, ki, kwc, kwd = jax.random.split(key, 7)

    x = jax.random.normal(kx, (B, C, H, W), dtype=jnp.float32)
    sigma = jnp.abs(jax.random.normal(ks, (B,), dtype=jnp.float32)) + 0.5
    uncond = jax.random.normal(ku, (B, T, D), dtype=jnp.float32)
    tensor = jax.random.normal(kt, (B, T, D), dtype=jnp.float32)       # cond text
    image_cond = jax.random.normal(ki, (B, C, H, W), dtype=jnp.float32)
    cond_scale = 7.0
    conds_list = [[(i, 1.0)] for i in range(B)]                        # standard CFG

    # deterministic synthetic inner-model parameters
    wc = jnp.eye(C, dtype=jnp.float32) * 0.9 \
        + 0.05 * jax.random.normal(kwc, (C, C), dtype=jnp.float32)
    wd = 0.05 * jax.random.normal(kwd, (C, D), dtype=jnp.float32)

    cfg_denoiser = make_cfg_denoiser(wc, wd)
    out = cfg_denoiser(x, sigma, uncond, tensor, cond_scale, image_cond,
                       conds_list)
    out = jax.block_until_ready(out)

    ref = reference_forward(x, sigma, uncond, tensor, cond_scale,
                            image_cond, conds_list, wc, wd)
    np.testing.assert_allclose(np.asarray(out), np.asarray(ref),
                               rtol=1e-4, atol=1e-4)
    print("KERNEL_OK")
</pallas_src>

<mosaic_0001>
module attributes {stable_mosaic.version = 11 : i64} {
  func.func @_standard_cfg_kernel(%arg0: i32, %arg1: memref<8x256xf32, #tpu.memory_space<vmem>>, %arg2: memref<8x256xf32, #tpu.memory_space<vmem>>, %arg3: memref<1x8x8xf32, #tpu.memory_space<vmem>>, %arg4: memref<2x8x1xf32, #tpu.memory_space<vmem>>, %arg5: memref<8x1xf32, #tpu.memory_space<vmem>>, %arg6: memref<8x256xf32, #tpu.memory_space<vmem>>) attributes {dimension_semantics = [#tpu.dimension_semantics<parallel>], iteration_bounds = array<i64: 1>, scalar_prefetch = 0 : i64, scratch_operands = 0 : i64, tpu.core_type = #tpu.core_type<tc>, window_params = [{transform_indices = @transform_0, window_bounds = array<i64: 8, 256>}, {transform_indices = @transform_1, window_bounds = array<i64: 8, 256>}, {transform_indices = @transform_2, window_bounds = array<i64: 1, 8, 8>}, {transform_indices = @transform_3, window_bounds = array<i64: 2, 8, 1>}, {transform_indices = @transform_4, window_bounds = array<i64: 8, 1>}, {transform_indices = @transform_5, window_bounds = array<i64: 8, 256>}]} {
    %c0 = arith.constant 0 : index
    %c0_0 = arith.constant 0 : index
    %c0_1 = arith.constant 0 : index
    %0 = vector.load %arg3[%c0, %c0_0, %c0_1] : memref<1x8x8xf32, #tpu.memory_space<vmem>>, vector<1x8x8xf32>
    %1 = vector.shape_cast %0 : vector<1x8x8xf32> to vector<8x8xf32>
    %c0_2 = arith.constant 0 : index
    %c0_3 = arith.constant 0 : index
    %2 = vector.load %arg1[%c0_2, %c0_3] : memref<8x256xf32, #tpu.memory_space<vmem>>, vector<8x256xf32>
    %cst = arith.constant dense<0.000000e+00> : vector<8x256xf32>
    %3 = tpu.matmul %1, %2, %cst {dimension_numbers = #tpu.dot_dimension_numbers<[1], [0], [0], [1], [0, 0, 1, 1], [], []>} : vector<8x8xf32>, vector<8x256xf32>, vector<8x256xf32> -> vector<8x256xf32>
    %c0_4 = arith.constant 0 : index
    %c0_5 = arith.constant 0 : index
    %4 = vector.load %arg2[%c0_4, %c0_5] : memref<8x256xf32, #tpu.memory_space<vmem>>, vector<8x256xf32>
    %cst_6 = arith.constant 1.000000e-01 : f32
    %5 = vector.broadcast %cst_6 : f32 to vector<8x256xf32>
    %6 = arith.mulf %5, %4 : vector<8x256xf32>
    %7 = arith.addf %3, %6 : vector<8x256xf32>
    %c0_7 = arith.constant 0 : index
    %c0_8 = arith.constant 0 : index
    %c0_9 = arith.constant 0 : index
    %8 = vector.load %arg4[%c0_7, %c0_8, %c0_9] : memref<2x8x1xf32, #tpu.memory_space<vmem>>, vector<1x8x1xf32>
    %9 = vector.shape_cast %8 : vector<1x8x1xf32> to vector<8x1xf32>
    %10 = vector.broadcast %9 : vector<8x1xf32> to vector<8x256xf32>
    %11 = arith.addf %7, %10 : vector<8x256xf32>
    %c1 = arith.constant 1 : index
    %c0_10 = arith.constant 0 : index
    %c0_11 = arith.constant 0 : index
    %12 = vector.load %arg4[%c1, %c0_10, %c0_11] : memref<2x8x1xf32, #tpu.memory_space<vmem>>, vector<1x8x1xf32>
    %13 = vector.shape_cast %12 : vector<1x8x1xf32> to vector<8x1xf32>
    %14 = vector.broadcast %13 : vector<8x1xf32> to vector<8x256xf32>
    %15 = arith.addf %7, %14 : vector<8x256xf32>
    %16 = arith.subf %11, %15 : vector<8x256xf32>
    %c0_12 = arith.constant 0 : index
    %c0_13 = arith.constant 0 : index
    %17 = vector.load %arg5[%c0_12, %c0_13] : memref<8x1xf32, #tpu.memory_space<vmem>>, vector<8x1xf32>
    %18 = vector.broadcast %17 : vector<8x1xf32> to vector<8x256xf32>
    %19 = arith.mulf %16, %18 : vector<8x256xf32>
    %20 = arith.addf %15, %19 : vector<8x256xf32>
    %c0_14 = arith.constant 0 : index
    %c0_15 = arith.constant 0 : index
    %21 = vector.load %arg6[%c0_14, %c0_15] : memref<8x256xf32, #tpu.memory_space<vmem>>, vector<8x256xf32>
    tpu.vector_store %arg6[%c0_14, %c0_15], %20 {strides = array<i32>} : memref<8x256xf32, #tpu.memory_space<vmem>>, vector<8x256xf32>,
    return
  }
  func.func @transform_0(%arg0: i32) -> (i32, i32) {
    %c0_i32 = arith.constant 0 : i32
    %c0_i32_0 = arith.constant 0 : i32
    return %arg0, %c0_i32 : i32, i32
  }
  func.func @transform_1(%arg0: i32) -> (i32, i32) {
    %c0_i32 = arith.constant 0 : i32
    %c0_i32_0 = arith.constant 0 : i32
    return %arg0, %c0_i32 : i32, i32
  }
  func.func @transform_2(%arg0: i32) -> (i32, i32, i32) {
    %c0_i32 = arith.constant 0 : i32
    %c0_i32_0 = arith.constant 0 : i32
    %c0_i32_1 = arith.constant 0 : i32
    return %arg0, %c0_i32, %c0_i32_0 : i32, i32, i32
  }
  func.func @transform_3(%arg0: i32) -> (i32, i32, i32) {
    %c0_i32 = arith.constant 0 : i32
    %c0_i32_0 = arith.constant 0 : i32
    %c0_i32_1 = arith.constant 0 : i32
    return %c0_i32, %arg0, %c0_i32_0 : i32, i32, i32
  }
  func.func @transform_4(%arg0: i32) -> (i32, i32) {
    %c0_i32 = arith.constant 0 : i32
    %c0_i32_0 = arith.constant 0 : i32
    return %arg0, %c0_i32 : i32, i32
  }
  func.func @transform_5(%arg0: i32) -> (i32, i32) {
    %c0_i32 = arith.constant 0 : i32
    %c0_i32_0 = arith.constant 0 : i32
    return %arg0, %c0_i32 : i32, i32
  }
}

</mosaic_0001>

<bundles_post_ra>
// kernel: _standard_cfg_forward.1
= control target key start
LH: loop header
LB: loop body
LE: loop exit
PB: predicated region body
PF: predicated region fallthrough
CT: control target
= control target key end

     0   :  { %v143_v2 = vmov 0.0   ;;  %vm27_vm0 = vcmask 64512   ;;  %v144_v4 = vmov 0   ;;  %s205_s0 = inlined_call_operand.vmem [shape: f32[8,256], index: 0, kind: input, shape index: {}]   ;;  %s206_s2 = inlined_call_operand.vmem [shape: f32[1,8,8], index: 2, kind: input, shape index: {}]   ;;  %s207_s3 = inlined_call_operand.vmem [shape: f32[2,8,1], index: 3, kind: input, shape index: {}]   ;;  %s208_s4 = inlined_call_operand.vmem [shape: f32[8,1], index: 4, kind: input, shape index: {}]   ;;  %s209_s1 = inlined_call_operand.vmem [shape: f32[8,256], index: 1, kind: input, shape index: {}]   ;;  %s210_s5 = inlined_call_operand.vmem [shape: f32[8,256], index: 5, kind: output, shape index: {}]  }
   0x1   :  { %v22_v0 = vld [vmem:[%s205_s0 + $0x8] sm:$0xff]  ;;  %v21_v1 = vld [vmem:[%s205_s0] sm:$0xff]  ;;  %95 = vmatprep.mubr.f32.mxu0 %v143_v2  ;;  %141 = vset.pattern.permute.xlu0 %v144_v4 }
   0x2   :  { %v20_v3 = vld [vmem:[%s206_s2] sm:$0xff]  ;;  %31 = vmatprep.subr.mxu0 %v22_v0  ;;  %142 = vset.pattern.permute.xlu1 %v144_v4  ;;  %v138_v7 = vld [vmem:[%s207_s3 + $0x8] sm:$0xff] }
   0x3   :  { %v102_v5 = vld [vmem:[%s207_s3] sm:$0xff]  ;;  %32 = vmatpush1.msra.mxu0 %v21_v1  ;;  %v24_v9 = vld [vmem:[%s209_s1 + $0x8] sm:$0xff] }
   0x4   :  { %v121_v6 = vld [vmem:[%s208_s4] sm:$0xff]  ;;  %105 = vperm.xlu0 %141, %v102_v5   ;;  %137 = vmatmul.mubr.msk.f32.vlgmr.msra.gmra.mrb[0].mxu0 %vm27_vm0, %v20_v3  ;;  %v26_v12 = vmul.f32 0.1, %v24_v9 }
   0x5   :  { %124 = vperm.xlu1 %142, %v121_v6   ;;  %v23_v8 = vld [vmem:[%s209_s1] sm:$0xff] }
   0x6   :  { %v25_v11 = vmul.f32 0.1, %v23_v8 }
   0x8   :  { %114 = vperm.xlu0 %141, %v138_v7  }
  0x83   :  { %v106_v10 = vpop.permute.xlu0 %105 }
  0x84   :  { %v125_v22 = vpop.permute.xlu1 %124 }
  0x87   :  { %v115_v16 = vpop.permute.xlu0 %114 }
  0xd7   :  { %v97_v13 = vpop.f32.mrb[0].mxu0 }
  0xd8   :  { %v98_v14 = vadd.f32 %v97_v13, %v25_v11  ;;  %v99_v15 = vpop.f32.mrb[1].mxu0 }
  0xd9   :  { %v100_v17 = vadd.f32 %v99_v15, %v26_v12 }
  0xda   :  { %v108_v18 = vadd.f32 %v106_v10, %v98_v14  ;;  %v117_v19 = vadd.f32 %v115_v16, %v98_v14 }
  0xdb   :  { %v109_v20 = vadd.f32 %v106_v10, %v100_v17  ;;  %v118_v21 = vadd.f32 %v115_v16, %v100_v17 }
  0xdc   :  { %v119_v23 = vsub.f32 %v108_v18, %v117_v19 }
  0xdd   :  { %v120_v24 = vsub.f32 %v109_v20, %v118_v21 }
  0xde   :  { %v127_v25 = vmul.f32 %v125_v22, %v119_v23 }
  0xdf   :  { %v128_v26 = vmul.f32 %v125_v22, %v120_v24 }
  0xe0   :  { %v129_v27 = vadd.f32 %v127_v25, %v117_v19 }
  0xe1   :  { %v130_v28 = vadd.f32 %v128_v26, %v118_v21 }
  0xe2   :  { %131 = vst [vmem:[%s210_s5] sm:$0xff] %v129_v27 }
  0xe3   :  { %132 = vst [vmem:[%s210_s5 + $0x8] sm:$0xff] %v130_v28 }

</bundles_post_ra>
